<compile_context>
chip_gen: v7x
topology: tpu7x:2x2x1
jax: 0.10.0
libtpu: 0.0.40
codegen_flags: <defaults>
</compile_context>

<pallas_src>
import math

import jax
import jax.numpy as jnp
from jax.experimental import pallas as pl
from jax.experimental.pallas import tpu as pltpu


# ---------------------------------------------------------------------------
# Fused Pallas kernel: h = x @ W1 + b1 ; y = relu(h) @ W2 + b2
# ---------------------------------------------------------------------------
def _generator_kernel(x_ref, w1_ref, b1_ref, w2_ref, b2_ref, y_ref, h_ref):
    x = x_ref[...]                                                    # (tm, D)
    h = jnp.dot(x, w1_ref[...], preferred_element_type=jnp.float32)   # (tm, H)  MXU
    h = h + b1_ref[...]                                               # bias broadcast (VPU)
    h_ref[...] = h.astype(h_ref.dtype)                                # second output: project1(x)
    a = jnp.maximum(h, 0.0)                                           # ReLU (VPU)
    y = jnp.dot(a, w2_ref[...], preferred_element_type=jnp.float32)   # (tm, D)  MXU
    y_ref[...] = (y + b2_ref[...]).astype(y_ref.dtype)                # first output


# ---------------------------------------------------------------------------
# Wrapper: 1-D row-tiled pallas_call, weights resident across all steps
# ---------------------------------------------------------------------------
def generator_forward(params, x, *, row_tile=512):
    """x: (B, L, d_model) -> (project2(relu(project1(x))), project1(x))."""
    B, L, D = x.shape
    H = params["w1"].shape[1]
    M = B * L

    x2d = x.reshape(M, D)
    b1 = params["b1"].reshape(1, H)
    b2 = params["b2"].reshape(1, D)

    # Pick the row tile: whole thing if small (no divisibility requirement when
    # the block equals the full dim), otherwise a multiple-of-8 tile.
    if M <= row_tile:
        tm = M
    else:
        tm = row_tile  # multiple of 8; partial last block is masked by Pallas
    grid = (pl.cdiv(M, tm),)

    y2d, h2d = pl.pallas_call(
        _generator_kernel,
        out_shape=(
            jax.ShapeDtypeStruct((M, D), jnp.float32),   # project2(relu(project1(x)))
            jax.ShapeDtypeStruct((M, H), jnp.float32),   # project1(x)
        ),
        grid=grid,
        in_specs=[
            pl.BlockSpec((tm, D), lambda i: (i, 0)),     # x rows
            pl.BlockSpec((D, H), lambda i: (0, 0)),      # W1 (in, out) — resident
            pl.BlockSpec((1, H), lambda i: (0, 0)),      # b1           — resident
            pl.BlockSpec((H, D), lambda i: (0, 0)),      # W2 (in, out) — resident
            pl.BlockSpec((1, D), lambda i: (0, 0)),      # b2           — resident
        ],
        out_specs=(
            pl.BlockSpec((tm, D), lambda i: (i, 0)),
            pl.BlockSpec((tm, H), lambda i: (i, 0)),
        ),
        compiler_params=pltpu.CompilerParams(
            dimension_semantics=("parallel",),
        ),
    )(x2d, params["w1"], b1, params["w2"], b2)

    return y2d.reshape(B, L, D), h2d.reshape(B, L, H)


# ---------------------------------------------------------------------------
# Deterministic parameter init (matches nn.Linear(d_model, hid_model) /
# nn.Linear(hid_model, d_model); stored as W^T relative to PyTorch layout)
# ---------------------------------------------------------------------------
def init_params(key, d_model, hid_model):
    k1, k2, k3, k4 = jax.random.split(key, 4)
    s1 = 1.0 / math.sqrt(d_model)     # project1: in_features = d_model
    s2 = 1.0 / math.sqrt(hid_model)   # project2: in_features = hid_model
    w1 = jax.random.uniform(k1, (d_model, hid_model), jnp.float32, -s1, s1)
    b1 = jax.random.uniform(k2, (hid_model,), jnp.float32, -s1, s1)
    w2 = jax.random.uniform(k3, (hid_model, d_model), jnp.float32, -s2, s2)
    b2 = jax.random.uniform(k4, (d_model,), jnp.float32, -s2, s2)
    return dict(w1=w1, b1=b1, w2=w2, b2=b2)


# ---------------------------------------------------------------------------
# Pure-JAX reference for correctness check
# ---------------------------------------------------------------------------
def _reference(params, x):
    h = x @ params["w1"] + params["b1"]
    y = jnp.maximum(h, 0.0) @ params["w2"] + params["b2"]
    return y, h


if __name__ == "__main__":
    d_model = 32
    hid_model = 64
    batch, seq = 2, 8

    key = jax.random.PRNGKey(0)
    kx, kp = jax.random.split(key, 2)
    x = jax.random.normal(kx, (batch, seq, d_model), jnp.float32)
    params = init_params(kp, d_model, hid_model)

    y, h = generator_forward(params, x)
    y = jax.block_until_ready(y)
    h = jax.block_until_ready(h)

    y_ref, h_ref = _reference(params, x)
    assert y.shape == (batch, seq, d_model)
    assert h.shape == (batch, seq, hid_model)
    assert jnp.allclose(y, y_ref, atol=1e-5, rtol=1e-5), "project2 output mismatch"
    assert jnp.allclose(h, h_ref, atol=1e-5, rtol=1e-5), "project1 output mismatch"

    print("KERNEL_OK")
</pallas_src>

<mosaic_0001>
module attributes {stable_mosaic.version = 11 : i64} {
  func.func @_generator_kernel(%arg0: i32, %arg1: memref<16x32xf32, #tpu.memory_space<vmem>>, %arg2: memref<32x64xf32, #tpu.memory_space<vmem>>, %arg3: memref<1x64xf32, #tpu.memory_space<vmem>>, %arg4: memref<64x32xf32, #tpu.memory_space<vmem>>, %arg5: memref<1x32xf32, #tpu.memory_space<vmem>>, %arg6: memref<16x32xf32, #tpu.memory_space<vmem>>, %arg7: memref<16x64xf32, #tpu.memory_space<vmem>>) attributes {dimension_semantics = [#tpu.dimension_semantics<parallel>], iteration_bounds = array<i64: 1>, scalar_prefetch = 0 : i64, scratch_operands = 0 : i64, tpu.core_type = #tpu.core_type<tc>, window_params = [{transform_indices = @transform_0, window_bounds = array<i64: 16, 32>}, {pipeline_mode = #tpu.pipeline_mode<synchronous>, transform_indices = @transform_1, window_bounds = array<i64: 32, 64>}, {pipeline_mode = #tpu.pipeline_mode<synchronous>, transform_indices = @transform_2, window_bounds = array<i64: 1, 64>}, {pipeline_mode = #tpu.pipeline_mode<synchronous>, transform_indices = @transform_3, window_bounds = array<i64: 64, 32>}, {pipeline_mode = #tpu.pipeline_mode<synchronous>, transform_indices = @transform_4, window_bounds = array<i64: 1, 32>}, {transform_indices = @transform_5, window_bounds = array<i64: 16, 32>}, {transform_indices = @transform_6, window_bounds = array<i64: 16, 64>}]} {
    %c0 = arith.constant 0 : index
    %c0_0 = arith.constant 0 : index
    %0 = vector.load %arg1[%c0, %c0_0] : memref<16x32xf32, #tpu.memory_space<vmem>>, vector<16x32xf32>
    %c0_1 = arith.constant 0 : index
    %c0_2 = arith.constant 0 : index
    %1 = vector.load %arg2[%c0_1, %c0_2] : memref<32x64xf32, #tpu.memory_space<vmem>>, vector<32x64xf32>
    %cst = arith.constant dense<0.000000e+00> : vector<16x64xf32>
    %2 = tpu.matmul %0, %1, %cst {dimension_numbers = #tpu.dot_dimension_numbers<[1], [0], [0], [1], [0, 0, 1, 1], [], []>} : vector<16x32xf32>, vector<32x64xf32>, vector<16x64xf32> -> vector<16x64xf32>
    %c0_3 = arith.constant 0 : index
    %c0_4 = arith.constant 0 : index
    %3 = vector.load %arg3[%c0_3, %c0_4] : memref<1x64xf32, #tpu.memory_space<vmem>>, vector<1x64xf32>
    %4 = vector.broadcast %3 : vector<1x64xf32> to vector<16x64xf32>
    %5 = arith.addf %2, %4 : vector<16x64xf32>
    %c0_5 = arith.constant 0 : index
    %c0_6 = arith.constant 0 : index
    %6 = vector.load %arg7[%c0_5, %c0_6] : memref<16x64xf32, #tpu.memory_space<vmem>>, vector<16x64xf32>
    tpu.vector_store %arg7[%c0_5, %c0_6], %5 {strides = array<i32>} : memref<16x64xf32, #tpu.memory_space<vmem>>, vector<16x64xf32>,
    %cst_7 = arith.constant 0.000000e+00 : f32
    %7 = vector.broadcast %cst_7 : f32 to vector<16x64xf32>
    %8 = arith.maximumf %5, %7 : vector<16x64xf32>
    %c0_8 = arith.constant 0 : index
    %c0_9 = arith.constant 0 : index
    %9 = vector.load %arg4[%c0_8, %c0_9] : memref<64x32xf32, #tpu.memory_space<vmem>>, vector<64x32xf32>
    %cst_10 = arith.constant dense<0.000000e+00> : vector<16x32xf32>
    %10 = tpu.matmul %8, %9, %cst_10 {dimension_numbers = #tpu.dot_dimension_numbers<[1], [0], [0], [1], [0, 0, 1, 1], [], []>} : vector<16x64xf32>, vector<64x32xf32>, vector<16x32xf32> -> vector<16x32xf32>
    %c0_11 = arith.constant 0 : index
    %c0_12 = arith.constant 0 : index
    %11 = vector.load %arg5[%c0_11, %c0_12] : memref<1x32xf32, #tpu.memory_space<vmem>>, vector<1x32xf32>
    %12 = vector.broadcast %11 : vector<1x32xf32> to vector<16x32xf32>
    %13 = arith.addf %10, %12 : vector<16x32xf32>
    %c0_13 = arith.constant 0 : index
    %c0_14 = arith.constant 0 : index
    %14 = vector.load %arg6[%c0_13, %c0_14] : memref<16x32xf32, #tpu.memory_space<vmem>>, vector<16x32xf32>
    tpu.vector_store %arg6[%c0_13, %c0_14], %13 {strides = array<i32>} : memref<16x32xf32, #tpu.memory_space<vmem>>, vector<16x32xf32>,
    return
  }
  func.func @transform_0(%arg0: i32) -> (i32, i32) {
    %c0_i32 = arith.constant 0 : i32
    %c0_i32_0 = arith.constant 0 : i32
    return %arg0, %c0_i32 : i32, i32
  }
  func.func @transform_1(%arg0: i32) -> (i32, i32) {
    %c0_i32 = arith.constant 0 : i32
    %c0_i32_0 = arith.constant 0 : i32
    %c0_i32_1 = arith.constant 0 : i32
    return %c0_i32, %c0_i32_0 : i32, i32
  }
  func.func @transform_2(%arg0: i32) -> (i32, i32) {
    %c0_i32 = arith.constant 0 : i32
    %c0_i32_0 = arith.constant 0 : i32
    %c0_i32_1 = arith.constant 0 : i32
    return %c0_i32, %c0_i32_0 : i32, i32
  }
  func.func @transform_3(%arg0: i32) -> (i32, i32) {
    %c0_i32 = arith.constant 0 : i32
    %c0_i32_0 = arith.constant 0 : i32
    %c0_i32_1 = arith.constant 0 : i32
    return %c0_i32, %c0_i32_0 : i32, i32
  }
  func.func @transform_4(%arg0: i32) -> (i32, i32) {
    %c0_i32 = arith.constant 0 : i32
    %c0_i32_0 = arith.constant 0 : i32
    %c0_i32_1 = arith.constant 0 : i32
    return %c0_i32, %c0_i32_0 : i32, i32
  }
  func.func @transform_5(%arg0: i32) -> (i32, i32) {
    %c0_i32 = arith.constant 0 : i32
    %c0_i32_0 = arith.constant 0 : i32
    return %arg0, %c0_i32 : i32, i32
  }
  func.func @transform_6(%arg0: i32) -> (i32, i32) {
    %c0_i32 = arith.constant 0 : i32
    %c0_i32_0 = arith.constant 0 : i32
    return %arg0, %c0_i32 : i32, i32
  }
}

</mosaic_0001>

<bundles_post_ra>
// kernel: tpu_custom_call.1
= control target key start
LH: loop header
LB: loop body
LE: loop exit
PB: predicated region body
PF: predicated region fallthrough
CT: control target
= control target key end

     0   :  { %12 = vsyncpa [#allocation3], 0  ;;  %vm37_vm0 = vcmask 261120   ;;  %s497_s0 = inlined_call_operand.vmem [shape: f32[16,32], index: 0, kind: input, shape index: {}]   ;;  %s498_s1 = inlined_call_operand.vmem [shape: f32[32,64], index: 1, kind: input, shape index: {}]   ;;  %s499_s2 = inlined_call_operand.vmem [shape: f32[1,64], index: 2, kind: input, shape index: {}]   ;;  %s500_s3 = inlined_call_operand.vmem [shape: f32[64,32], index: 3, kind: input, shape index: {}]   ;;  %s501_s4 = inlined_call_operand.vmem [shape: f32[1,32], index: 4, kind: input, shape index: {}]   ;;  %s502_s5 = inlined_call_operand.hbm [shape: f32[16,32], index: 5, kind: output, shape index: {0}]   ;;  %s503_s6 = inlined_call_operand.hbm [shape: f32[16,64], index: 6, kind: output, shape index: {1}]  }
   0x1   :  { %v26_v0 = vld [vmem:[%s498_s1] sm:$0xff]  ;;  %v27_v1 = vld [vmem:[%s498_s1 + $0x8] sm:$0xff]  ;;  %v28_v2 = vld [vmem:[%s498_s1 + $0x10] sm:$0xff] }
   0x2   :  { %v306_v3 = vpack.c.bf16 %v27_v1, %v26_v0  ;;  %v29_v4 = vld [vmem:[%s498_s1 + $0x18] sm:$0xff]  ;;  %v24_v5 = vld [vmem:[%s497_s0] sm:$0xff]  ;;  %v125_v8 = vld [vmem:[%s500_s3 + $0x8] sm:$0xff] }
   0x3   :  { %v310_v6 = vpack.c.bf16 %v29_v4, %v28_v2  ;;  %284 = vmatprep.mubr.msk.f32.mxu0 %vm37_vm0, %v24_v5  ;;  %v124_v7 = vld [vmem:[%s500_s3] sm:$0xff]  ;;  %v126_v9 = vld [vmem:[%s500_s3 + $0x10] sm:$0xff]  ;;  %v127_v11 = vld [vmem:[%s500_s3 + $0x18] sm:$0xff] }
   0x4   :  { %307 = vmatprep.subr.bf16.mxu0 %v306_v3  ;;  %v314_v10 = vpack.c.bf16 %v125_v8, %v124_v7  ;;  %v318_v12 = vpack.c.bf16 %v127_v11, %v126_v9  ;;  %v128_v13 = vld [vmem:[%s500_s3 + $0x20] sm:$0xff]  ;;  %v129_v14 = vld [vmem:[%s500_s3 + $0x28] sm:$0xff] }
   0x5   :  { %309 = vmatpush3.bf16.msra.mxu0 %v306_v3 }
   0x6   :  { %13 = vsyncpa [#allocation5], 0  ;;  %311 = vmatprep.subr.bf16.mxu0 %v310_v6  ;;  %315 = vmatprep.subr.bf16.mxu1 %v314_v10  ;;  %v322_v15 = vpack.c.bf16 %v129_v14, %v128_v13  ;;  %v25_v16 = vld [vmem:[%s497_s0 + $0x8] sm:$0xff]  ;;  %v130_v17 = vld [vmem:[%s500_s3 + $0x30] sm:$0xff]  ;;  %vm119_vm1 = vcmask 523264   ;;  %s382_s0 = smov [#allocation4]  }
   0x7   :  { %317 = vmatpush3.bf16.msra.mxu1 %v314_v10  ;;  %v131_v18 = vld [vmem:[%s500_s3 + $0x38] sm:$0xff]  ;;  %v254_v20 = vld [vmem:[%s499_s2] ss:$0 sm:$0xff]  ;;  %s239_s3 = sshll.u32 %s382_s0, 4  ;;  %s240_s3 = int_to_ptr.vmem [resolvable:$true] %s239_s3 }
   0x8   :  { %319 = vmatprep.subr.bf16.mxu1 %v318_v12  ;;  %v326_v19 = vpack.c.bf16 %v131_v18, %v130_v17  ;;  %s334_s26 = scalar_lea.vmem %s240_s3, 256  ;;  %p339_p1 = scmp.lt.s32.totalorder %s240_s3, %s240_s3 }
   0x9   :  { %313 = vmatpush3.bf16.msra.mxu0 %v310_v6  ;;  %p335_p0 = scmp.ne.s32.totalorder %s240_s3, %s334_s26  ;;  %p340_p2 = scmp.lt.s32.totalorder %s334_s26, %s334_s26 }
   0xb   :  { %321 = vmatpush3.bf16.msra.mxu1 %v318_v12  ;;  %p341_p3 = por %p340_p2, %p339_p1 }
   0xc   :  { %285 = vmatmul.mubr.msk.f32.vlgmr.msra.gmra.mrb[0].mxu0 %vm37_vm0, %v25_v16  ;;  %323 = vmatprep.subr.bf16.mxu1 %v322_v15 }
   0xd   :  { %p342_p4 = pnand %p341_p3, %p335_p0 }
   0xf   :  { %325 = vmatpush3.bf16.msra.mxu1 %v322_v15 }
  0x10   :  { %327 = vmatprep.subr.bf16.mxu1 %v326_v19 }
  0x13   :  { %329 = vmatpush3.bf16.msra.mxu1 %v326_v19 }
  0xdf   :  { %v286_v21 = vpop.f32.mrb[0].mxu0 }
  0xe0   :  { %v116_v22 = vadd.f32 %v286_v21, %v254_v20  ;;  %v110_v23 = vpop.f32.mrb[1].mxu0 }
  0xe1   :  { %v111_v24 = vadd.f32 %v254_v20, %v110_v23 }
  0xe2   :  { %121 = vst.msk [vmem:[#allocation4 + $0x8] sm:$0xff] %vm119_vm1, %v116_v22  ;;  %v123_v26 = vmax.f32 %v116_v22, 0.0 }
  0xe3   :  { %120 = vst.msk [vmem:[#allocation4] sm:$0xff] %vm119_vm1, %v111_v24  ;;  %v122_v25 = vmax.f32 %v111_v24, 0.0 }
  0xe5   :  { %303 = vmatprep.mubr.msk.f32.mxu1 %vm119_vm1, %v122_v25 }
  0xe6   :  { %304 = vmatmul.mubr.msk.f32.vlgmr.msra.gmra.mrb[0].mxu1 %vm119_vm1, %v123_v26 }
  0xe7   :  { %345 = shalt.err (!%p342_p4)
}
  0xe8   :  { %s346_s28 = scalar_lea.hbm %s503_s6, 256 }
  0xe9   :  { %p347_p5 = scmp.ne.s32.totalorder %s503_s6, %s346_s28  ;;  %p350_p6 = scmp.lt.u32.totalorder %s346_s28, %s503_s6 }
  0xeb   :  { %p352_p7 = pnand %p350_p6, %p347_p5 }
  0xed   :  { %355 = shalt.err (!%p352_p7)
}
  0xee   :  { %s383_s9 = smov 128   ;;  %s384_s10 = smov 8   ;;  %v257_v27 = vld [vmem:[%s501_s4] ss:$0 sm:$0xff] }
  0xef   :  { %245 = dma.vmem_to_hbm [thread:$0]  %s240_s3, 256, %s503_s6, [#allocation5], %s383_s9, %s383_s9, %s384_s10  }
  0xf0   :  { %s385_s14 = smov [#allocation2]  }
  0xf1   :  { %s227_s15 = sshll.u32 %s385_s14, 4  ;;  %s228_s15 = int_to_ptr.vmem [resolvable:$true] %s227_s15 }
  0xf2   :  { %s356_s16 = scalar_lea.vmem %s228_s15, 256  ;;  %p361_p9 = scmp.lt.s32.totalorder %s228_s15, %s228_s15 }
  0xf3   :  { %p357_p8 = scmp.ne.s32.totalorder %s228_s15, %s356_s16  ;;  %p362_p10 = scmp.lt.s32.totalorder %s356_s16, %s356_s16 }
  0xf5   :  { %p363_p11 = por %p362_p10, %p361_p9 }
  0xf7   :  { %p364_p12 = pnand %p363_p11, %p357_p8 }
 0x1b9   :  { %v305_v28 = vpop.f32.mrb[0].mxu1 }
 0x1ba   :  { %v217_v29 = vadd.f32 %v305_v28, %v257_v27  ;;  %v211_v30 = vpop.f32.mrb[1].mxu1 }
 0x1bb   :  { %v212_v31 = vadd.f32 %v257_v27, %v211_v30 }
 0x1bc   :  { %221 = vst.msk [vmem:[#allocation2 + $0x8] sm:$0xff] %vm37_vm0, %v217_v29 }
 0x1bd   :  { %220 = vst.msk [vmem:[#allocation2] sm:$0xff] %vm37_vm0, %v212_v31 }
 0x1be   :  { %367 = shalt.err (!%p364_p12)
}
 0x1bf   :  { %s368_s17 = scalar_lea.hbm %s502_s5, 256 }
 0x1c0   :  { %p369_p13 = scmp.ne.s32.totalorder %s502_s5, %s368_s17  ;;  %p372_p0 = scmp.lt.u32.totalorder %s368_s17, %s502_s5 }
 0x1c2   :  { %p374_p1 = pnand %p372_p0, %p369_p13 }
 0x1c4   :  { %377 = shalt.err (!%p374_p1)
}
 0x1c5   :  { %233 = dma.vmem_to_hbm [thread:$0]  %s228_s15, 256, %s502_s5, [#allocation3], %s383_s9, %s383_s9, %s384_s10  }
 0x1c6   :  { %378 = dma.done.wait [#allocation3], 256  }
 0x1c7   :  { %379 = vsyncadd [#allocation3], 4294967040 }
 0x1c8   :  { %380 = dma.done.wait [#allocation5], 256  }
 0x1c9   :  { %381 = vsyncadd [#allocation5], 4294967040 }
 0x1ca   :  { %252 = vsyncpa [#allocation3], 1 }
 0x1cb   :  { %253 = vsyncpa [#allocation5], 1 }

</bundles_post_ra>
